<compile_context>
chip_gen: v7x
topology: tpu7x:2x2x1
jax: 0.10.0
libtpu: 0.0.40
codegen_flags: <defaults>
</compile_context>

<pallas_src>
import jax
import jax.numpy as jnp
from jax.experimental import pallas as pl
from jax.experimental.pallas import tpu as pltpu

EPS = 1e-5


def _bn1_relu_kernel(x_ref, g1_ref, b1_ref, xr_ref):
    """Training-mode BN (batch stats over pixels) + ReLU for one channel tile.

    x_ref  : (P, tc) f32   pixel-major slab, tc input channels
    g1,b1  : (1, tc) f32   BN1 affine params
    xr_ref : (P, tc) bf16  post-ReLU activations (bf16 for the MXU)
    """
    x = x_ref[...]
    mean = jnp.mean(x, axis=0, keepdims=True)
    d = x - mean
    var = jnp.mean(d * d, axis=0, keepdims=True)            # biased variance
    scale = g1_ref[...] * jax.lax.rsqrt(var + EPS)           # (1, tc) cheap
    shift = b1_ref[...] - mean * scale                       # (1, tc) cheap
    xr_ref[...] = jnp.maximum(x * scale + shift, 0.0).astype(xr_ref.dtype)


def _conv1x1_bn2_kernel(xr_ref, wt_ref, g2_ref, b2_ref, o_ref):
    """1x1 conv (per-pixel matmul over channels) + BN2 for one Cout tile.

    xr_ref : (P, Cin) bf16  full post-ReLU slab (resident across grid steps)
    wt_ref : (Cin, tn) bf16 transposed conv weight tile
    g2,b2  : (1, tn)  f32   BN2 affine params for this tile
    o_ref  : (P, tn)  f32   output tile
    """
    y = jnp.dot(xr_ref[...], wt_ref[...], preferred_element_type=jnp.float32)
    mean = jnp.mean(y, axis=0, keepdims=True)
    d = y - mean
    var = jnp.mean(d * d, axis=0, keepdims=True)             # biased variance
    scale = g2_ref[...] * jax.lax.rsqrt(var + EPS)
    shift = b2_ref[...] - mean * scale
    o_ref[...] = (y * scale + shift).astype(o_ref.dtype)


def bn_relu_conv1x1_bn(x_nchw, gamma1, beta1, w_conv, gamma2, beta2,
                       *, tile_c=512, tile_n=512):
    """x_nchw: (N, C, H, W) f32; w_conv: (Cout, Cin) (1x1 conv weight squeezed)."""
    N, C, H, W = x_nchw.shape
    Cout, Cin = w_conv.shape
    assert Cin == C
    P = N * H * W

    # NCHW -> (P, C) channels-last pixel slab (layout plumbing in the wrapper)
    x_flat = jnp.transpose(x_nchw, (0, 2, 3, 1)).reshape(P, C)
    wt = jnp.transpose(w_conv, (1, 0)).astype(jnp.bfloat16)   # (Cin, Cout) bf16

    g1 = gamma1.reshape(1, C).astype(jnp.float32)
    b1 = beta1.reshape(1, C).astype(jnp.float32)
    g2 = gamma2.reshape(1, Cout).astype(jnp.float32)
    b2 = beta2.reshape(1, Cout).astype(jnp.float32)

    tc = min(tile_c, C)
    assert C % tc == 0 and (tc % 128 == 0 or tc == C)
    tn = min(tile_n, Cout)
    assert Cout % tn == 0 and (tn % 128 == 0 or tn == Cout)

    # ---- Stage 1: BN1 + ReLU, computed exactly once per channel tile ----
    xr = pl.pallas_call(
        _bn1_relu_kernel,
        out_shape=jax.ShapeDtypeStruct((P, C), jnp.bfloat16),
        grid_spec=pltpu.PrefetchScalarGridSpec(
            num_scalar_prefetch=0,
            grid=(C // tc,),
            in_specs=[
                pl.BlockSpec((P, tc), lambda j: (0, j)),   # x slab tile
                pl.BlockSpec((1, tc), lambda j: (0, j)),   # gamma1 tile
                pl.BlockSpec((1, tc), lambda j: (0, j)),   # beta1 tile
            ],
            out_specs=pl.BlockSpec((P, tc), lambda j: (0, j)),
        ),
        compiler_params=pltpu.CompilerParams(dimension_semantics=("parallel",)),
    )(x_flat, g1, b1)

    # ---- Stage 2: 1x1 conv (MXU, bf16 x bf16 -> f32) + BN2, tiled over Cout ----
    out_flat = pl.pallas_call(
        _conv1x1_bn2_kernel,
        out_shape=jax.ShapeDtypeStruct((P, Cout), jnp.float32),
        grid_spec=pltpu.PrefetchScalarGridSpec(
            num_scalar_prefetch=0,
            grid=(Cout // tn,),
            in_specs=[
                pl.BlockSpec((P, C), lambda j: (0, 0)),    # activation slab (resident)
                pl.BlockSpec((C, tn), lambda j: (0, j)),   # W^T tile (bf16, streamed)
                pl.BlockSpec((1, tn), lambda j: (0, j)),   # gamma2 tile
                pl.BlockSpec((1, tn), lambda j: (0, j)),   # beta2 tile
            ],
            out_specs=pl.BlockSpec((P, tn), lambda j: (0, j)),
        ),
        compiler_params=pltpu.CompilerParams(dimension_semantics=("parallel",)),
    )(xr, wt, g2, b2)

    # (P, Cout) -> NCHW
    return jnp.transpose(out_flat.reshape(N, H, W, Cout),
                         (0, 3, 1, 2)).astype(x_nchw.dtype)


def _reference(x_nchw, gamma1, beta1, w_conv, gamma2, beta2):
    """Pure-JAX f32 reference (training-mode BN) for sanity checking."""
    def bn(x, g, b):
        mean = jnp.mean(x, axis=(0, 2, 3), keepdims=True)
        var = jnp.mean((x - mean) ** 2, axis=(0, 2, 3), keepdims=True)
        return ((x - mean) / jnp.sqrt(var + EPS) * g.reshape(1, -1, 1, 1)
                + b.reshape(1, -1, 1, 1))

    h = jnp.maximum(bn(x_nchw, gamma1, beta1), 0.0)
    y = jnp.einsum("nchw,oc->nohw", h, w_conv)
    return bn(y, gamma2, beta2)


if __name__ == "__main__":
    # Small shapes consistent with the module (original: N=1, C=2048, H=W=7)
    N, C, H, W = 2, 256, 8, 8
    Cout = C

    key = jax.random.PRNGKey(0)
    kx, kw, kg1, kb1, kg2, kb2 = jax.random.split(key, 6)

    x = jax.random.normal(kx, (N, C, H, W), dtype=jnp.float32)
    # Conv2d 1x1 weight (Cout, Cin, 1, 1) -> stored squeezed as (Cout, Cin)
    w_conv = jax.random.normal(kw, (Cout, C), dtype=jnp.float32) * (1.0 / jnp.sqrt(C))
    gamma1 = 1.0 + 0.1 * jax.random.normal(kg1, (C,), dtype=jnp.float32)
    beta1 = 0.1 * jax.random.normal(kb1, (C,), dtype=jnp.float32)
    gamma2 = 1.0 + 0.1 * jax.random.normal(kg2, (Cout,), dtype=jnp.float32)
    beta2 = 0.1 * jax.random.normal(kb2, (Cout,), dtype=jnp.float32)

    fn = jax.jit(bn_relu_conv1x1_bn)
    out = jax.block_until_ready(fn(x, gamma1, beta1, w_conv, gamma2, beta2))

    ref = _reference(x, gamma1, beta1, w_conv, gamma2, beta2)
    assert out.shape == (N, Cout, H, W)
    # bf16 conv operands vs f32 reference -> slightly looser tolerance
    assert jnp.allclose(out, ref, atol=5e-2, rtol=5e-2), "mismatch vs reference"

    print("KERNEL_OK")
</pallas_src>

<mosaic_0001>
module attributes {stable_mosaic.version = 11 : i64} {
  func.func @_conv1x1_bn2_kernel(%arg0: i32, %arg1: memref<128x256xbf16, #tpu.memory_space<vmem>>, %arg2: memref<256x256xbf16, #tpu.memory_space<vmem>>, %arg3: memref<1x256xf32, #tpu.memory_space<vmem>>, %arg4: memref<1x256xf32, #tpu.memory_space<vmem>>, %arg5: memref<128x256xf32, #tpu.memory_space<vmem>>) attributes {dimension_semantics = [#tpu.dimension_semantics<parallel>], iteration_bounds = array<i64: 1>, scalar_prefetch = 0 : i64, scratch_operands = 0 : i64, tpu.core_type = #tpu.core_type<tc>, window_params = [{pipeline_mode = #tpu.pipeline_mode<synchronous>, transform_indices = @transform_0, window_bounds = array<i64: 128, 256>}, {transform_indices = @transform_1, window_bounds = array<i64: 256, 256>}, {transform_indices = @transform_2, window_bounds = array<i64: 1, 256>}, {transform_indices = @transform_3, window_bounds = array<i64: 1, 256>}, {transform_indices = @transform_4, window_bounds = array<i64: 128, 256>}]} {
    %c0 = arith.constant 0 : index
    %c0_0 = arith.constant 0 : index
    %0 = vector.load %arg1[%c0, %c0_0] : memref<128x256xbf16, #tpu.memory_space<vmem>>, vector<128x256xbf16>
    %c0_1 = arith.constant 0 : index
    %c0_2 = arith.constant 0 : index
    %1 = vector.load %arg2[%c0_1, %c0_2] : memref<256x256xbf16, #tpu.memory_space<vmem>>, vector<256x256xbf16>
    %cst = arith.constant dense<0.000000e+00> : vector<128x256xf32>
    %2 = tpu.matmul %0, %1, %cst {dimension_numbers = #tpu.dot_dimension_numbers<[1], [0], [0], [1], [0, 0, 1, 1], [], []>} : vector<128x256xbf16>, vector<256x256xbf16>, vector<128x256xf32> -> vector<128x256xf32>
    %cst_3 = arith.constant dense<0.000000e+00> : vector<256xf32>
    %3 = vector.multi_reduction <add>, %2, %cst_3 [0] : vector<128x256xf32> to vector<256xf32>
    %4 = vector.shape_cast %3 : vector<256xf32> to vector<1x256xf32>
    %cst_4 = arith.constant 1.280000e+02 : f32
    %5 = vector.broadcast %cst_4 : f32 to vector<1x256xf32>
    %6 = arith.divf %4, %5 : vector<1x256xf32>
    %7 = vector.broadcast %6 : vector<1x256xf32> to vector<128x256xf32>
    %8 = arith.subf %2, %7 : vector<128x256xf32>
    %9 = arith.mulf %8, %8 : vector<128x256xf32>
    %cst_5 = arith.constant dense<0.000000e+00> : vector<256xf32>
    %10 = vector.multi_reduction <add>, %9, %cst_5 [0] : vector<128x256xf32> to vector<256xf32>
    %11 = vector.shape_cast %10 : vector<256xf32> to vector<1x256xf32>
    %cst_6 = arith.constant 1.280000e+02 : f32
    %12 = vector.broadcast %cst_6 : f32 to vector<1x256xf32>
    %13 = arith.divf %11, %12 : vector<1x256xf32>
    %c0_7 = arith.constant 0 : index
    %c0_8 = arith.constant 0 : index
    %14 = vector.load %arg3[%c0_7, %c0_8] : memref<1x256xf32, #tpu.memory_space<vmem>>, vector<1x256xf32>
    %cst_9 = arith.constant 9.99999974E-6 : f32
    %15 = vector.broadcast %cst_9 : f32 to vector<1x256xf32>
    %16 = arith.addf %13, %15 : vector<1x256xf32>
    %17 = math.rsqrt %16 : vector<1x256xf32>
    %18 = arith.mulf %14, %17 : vector<1x256xf32>
    %c0_10 = arith.constant 0 : index
    %c0_11 = arith.constant 0 : index
    %19 = vector.load %arg4[%c0_10, %c0_11] : memref<1x256xf32, #tpu.memory_space<vmem>>, vector<1x256xf32>
    %20 = arith.mulf %6, %18 : vector<1x256xf32>
    %21 = arith.subf %19, %20 : vector<1x256xf32>
    %22 = vector.broadcast %18 : vector<1x256xf32> to vector<128x256xf32>
    %23 = arith.mulf %2, %22 : vector<128x256xf32>
    %24 = vector.broadcast %21 : vector<1x256xf32> to vector<128x256xf32>
    %25 = arith.addf %23, %24 : vector<128x256xf32>
    %c0_12 = arith.constant 0 : index
    %c0_13 = arith.constant 0 : index
    %26 = vector.load %arg5[%c0_12, %c0_13] : memref<128x256xf32, #tpu.memory_space<vmem>>, vector<128x256xf32>
    tpu.vector_store %arg5[%c0_12, %c0_13], %25 {strides = array<i32>} : memref<128x256xf32, #tpu.memory_space<vmem>>, vector<128x256xf32>,
    return
  }
  func.func @transform_0(%arg0: i32) -> (i32, i32) {
    %c0_i32 = arith.constant 0 : i32
    %c0_i32_0 = arith.constant 0 : i32
    %c0_i32_1 = arith.constant 0 : i32
    return %c0_i32, %c0_i32_0 : i32, i32
  }
  func.func @transform_1(%arg0: i32) -> (i32, i32) {
    %c0_i32 = arith.constant 0 : i32
    %c0_i32_0 = arith.constant 0 : i32
    return %c0_i32, %arg0 : i32, i32
  }
  func.func @transform_2(%arg0: i32) -> (i32, i32) {
    %c0_i32 = arith.constant 0 : i32
    %c0_i32_0 = arith.constant 0 : i32
    return %c0_i32, %arg0 : i32, i32
  }
  func.func @transform_3(%arg0: i32) -> (i32, i32) {
    %c0_i32 = arith.constant 0 : i32
    %c0_i32_0 = arith.constant 0 : i32
    return %c0_i32, %arg0 : i32, i32
  }
  func.func @transform_4(%arg0: i32) -> (i32, i32) {
    %c0_i32 = arith.constant 0 : i32
    %c0_i32_0 = arith.constant 0 : i32
    return %c0_i32, %arg0 : i32, i32
  }
}

module attributes {stable_mosaic.version = 11 : i64} {
  func.func @_bn1_relu_kernel(%arg0: i32, %arg1: memref<128x256xf32, #tpu.memory_space<vmem>>, %arg2: memref<1x256xf32, #tpu.memory_space<vmem>>, %arg3: memref<1x256xf32, #tpu.memory_space<vmem>>, %arg4: memref<128x256xbf16, #tpu.memory_space<vmem>>) attributes {dimension_semantics = [#tpu.dimension_semantics<parallel>], iteration_bounds = array<i64: 1>, scalar_prefetch = 0 : i64, scratch_operands = 0 : i64, tpu.core_type = #tpu.core_type<tc>, window_params = [{transform_indices = @transform_0, window_bounds = array<i64: 128, 256>}, {transform_indices = @transform_1, window_bounds = array<i64: 1, 256>}, {transform_indices = @transform_2, window_bounds = array<i64: 1, 256>}, {transform_indices = @transform_3, window_bounds = array<i64: 128, 256>}]} {
    %c0 = arith.constant 0 : index
    %c0_0 = arith.constant 0 : index
    %0 = vector.load %arg1[%c0, %c0_0] : memref<128x256xf32, #tpu.memory_space<vmem>>, vector<128x256xf32>
    %cst = arith.constant dense<0.000000e+00> : vector<256xf32>
    %1 = vector.multi_reduction <add>, %0, %cst [0] : vector<128x256xf32> to vector<256xf32>
    %2 = vector.shape_cast %1 : vector<256xf32> to vector<1x256xf32>
    %cst_1 = arith.constant 1.280000e+02 : f32
    %3 = vector.broadcast %cst_1 : f32 to vector<1x256xf32>
    %4 = arith.divf %2, %3 : vector<1x256xf32>
    %5 = vector.broadcast %4 : vector<1x256xf32> to vector<128x256xf32>
    %6 = arith.subf %0, %5 : vector<128x256xf32>
    %7 = arith.mulf %6, %6 : vector<128x256xf32>
    %cst_2 = arith.constant dense<0.000000e+00> : vector<256xf32>
    %8 = vector.multi_reduction <add>, %7, %cst_2 [0] : vector<128x256xf32> to vector<256xf32>
    %9 = vector.shape_cast %8 : vector<256xf32> to vector<1x256xf32>
    %cst_3 = arith.constant 1.280000e+02 : f32
    %10 = vector.broadcast %cst_3 : f32 to vector<1x256xf32>
    %11 = arith.divf %9, %10 : vector<1x256xf32>
    %c0_4 = arith.constant 0 : index
    %c0_5 = arith.constant 0 : index
    %12 = vector.load %arg2[%c0_4, %c0_5] : memref<1x256xf32, #tpu.memory_space<vmem>>, vector<1x256xf32>
    %cst_6 = arith.constant 9.99999974E-6 : f32
    %13 = vector.broadcast %cst_6 : f32 to vector<1x256xf32>
    %14 = arith.addf %11, %13 : vector<1x256xf32>
    %15 = math.rsqrt %14 : vector<1x256xf32>
    %16 = arith.mulf %12, %15 : vector<1x256xf32>
    %c0_7 = arith.constant 0 : index
    %c0_8 = arith.constant 0 : index
    %17 = vector.load %arg3[%c0_7, %c0_8] : memref<1x256xf32, #tpu.memory_space<vmem>>, vector<1x256xf32>
    %18 = arith.mulf %4, %16 : vector<1x256xf32>
    %19 = arith.subf %17, %18 : vector<1x256xf32>
    %20 = vector.broadcast %16 : vector<1x256xf32> to vector<128x256xf32>
    %21 = arith.mulf %0, %20 : vector<128x256xf32>
    %22 = vector.broadcast %19 : vector<1x256xf32> to vector<128x256xf32>
    %23 = arith.addf %21, %22 : vector<128x256xf32>
    %cst_9 = arith.constant 0.000000e+00 : f32
    %24 = vector.broadcast %cst_9 : f32 to vector<128x256xf32>
    %25 = arith.maximumf %23, %24 : vector<128x256xf32>
    %26 = arith.truncf %25 : vector<128x256xf32> to vector<128x256xbf16>
    %c0_10 = arith.constant 0 : index
    %c0_11 = arith.constant 0 : index
    %27 = vector.load %arg4[%c0_10, %c0_11] : memref<128x256xbf16, #tpu.memory_space<vmem>>, vector<128x256xbf16>
    tpu.vector_store %arg4[%c0_10, %c0_11], %26 {strides = array<i32>} : memref<128x256xbf16, #tpu.memory_space<vmem>>, vector<128x256xbf16>,
    return
  }
  func.func @transform_0(%arg0: i32) -> (i32, i32) {
    %c0_i32 = arith.constant 0 : i32
    %c0_i32_0 = arith.constant 0 : i32
    return %c0_i32, %arg0 : i32, i32
  }
  func.func @transform_1(%arg0: i32) -> (i32, i32) {
    %c0_i32 = arith.constant 0 : i32
    %c0_i32_0 = arith.constant 0 : i32
    return %c0_i32, %arg0 : i32, i32
  }
  func.func @transform_2(%arg0: i32) -> (i32, i32) {
    %c0_i32 = arith.constant 0 : i32
    %c0_i32_0 = arith.constant 0 : i32
    return %c0_i32, %arg0 : i32, i32
  }
  func.func @transform_3(%arg0: i32) -> (i32, i32) {
    %c0_i32 = arith.constant 0 : i32
    %c0_i32_0 = arith.constant 0 : i32
    return %c0_i32, %arg0 : i32, i32
  }
}

</mosaic_0001>

<bundles_post_ra>
// kernel: bn_relu_conv1x1_bn.2
= control target key start
LH: loop header
LB: loop body
LE: loop exit
PB: predicated region body
PF: predicated region fallthrough
CT: control target
= control target key end

     0   :  { %8 = vsyncpa [#allocation3], 0  ;;  %s558_s12 = smov [#allocation2]   ;;  %s924_s0 = inlined_call_operand.hbm [shape: f32[128,256], index: 0, kind: input, shape index: {}]   ;;  %s925_s1 = inlined_call_operand.vmem [shape: f32[1,256], index: 1, kind: input, shape index: {}]   ;;  %s926_s2 = inlined_call_operand.vmem [shape: f32[1,256], index: 2, kind: input, shape index: {}]   ;;  %s927_s3 = inlined_call_operand.vmem [shape: bf16[128,256], index: 3, kind: output, shape index: {}]  }
   0x1   :  { %s14_s13 = sshll.u32 %s558_s12, 4  ;;  %s534_s16 = scalar_lea.hbm %s924_s0, 4096  ;;  %s15_s13 = int_to_ptr.vmem [resolvable:$true] %s14_s13 }
   0x2   :  { %p535_p0 = scmp.ne.s32.totalorder %s924_s0, %s534_s16  ;;  %p538_p1 = scmp.lt.u32.totalorder %s534_s16, %s924_s0 }
   0x4   :  { %p540_p2 = pnand %p538_p1, %p535_p0 }
   0x6   :  { %543 = shalt.err (!%p540_p2)
}
   0x7   :  { %s544_s21 = scalar_lea.vmem %s15_s13, 4096  ;;  %p549_p4 = scmp.lt.s32.totalorder %s15_s13, %s15_s13 }
   0x8   :  { %p545_p3 = scmp.ne.s32.totalorder %s15_s13, %s544_s21  ;;  %p550_p5 = scmp.lt.s32.totalorder %s544_s21, %s544_s21 }
   0xa   :  { %p551_p6 = por %p550_p5, %p549_p4 }
   0xc   :  { %p552_p7 = pnand %p551_p6, %p545_p3 }
   0xe   :  { %555 = shalt.err (!%p552_p7)
}
   0xf   :  { %s559_s22 = smov 256   ;;  %s560_s23 = smov 16  }
  0x10   :  { %20 = dma.hbm_to_vmem [thread:$0]  %s924_s0, 4096, %s15_s13, [#allocation3], %s559_s22, %s559_s22, %s560_s23  }
  0x11   :  { %556 = dma.done.wait [#allocation3], 4096  }
  0x12   :  { %557 = vsyncadd [#allocation3], 4294963200  ;;  %v594_v0 = vld [vmem:[#allocation2] sm:$0xff]  ;;  %v596_v1 = vld [vmem:[#allocation2 + $0x8] sm:$0xff] }
  0x13   :  { %v598_v2 = vld [vmem:[#allocation2 + $0x10] sm:$0xff]  ;;  %v600_v3 = vld [vmem:[#allocation2 + $0x18] sm:$0xff]  ;;  %v602_v4 = vld [vmem:[#allocation2 + $0x20] sm:$0xff] }
  0x14   :  { %v604_v5 = vld [vmem:[#allocation2 + $0x28] sm:$0xff]  ;;  %v60_v6 = vadd.f32 %v598_v2, %v594_v0  ;;  %v608_v7 = vld [vmem:[#allocation2 + $0x30] sm:$0xff]  ;;  %v81_v8 = vadd.f32 %v600_v3, %v596_v1  ;;  %v612_v9 = vld [vmem:[#allocation2 + $0x38] sm:$0xff] }
  0x15   :  { %v615_v11 = vld [vmem:[#allocation2 + $0x40] sm:$0xff]  ;;  %v618_v13 = vld [vmem:[#allocation2 + $0x48] sm:$0xff]  ;;  %v621_v15 = vld [vmem:[#allocation2 + $0x50] sm:$0xff] }
  0x16   :  { %v61_v10 = vadd.f32 %v60_v6, %v602_v4  ;;  %v82_v12 = vadd.f32 %v81_v8, %v604_v5  ;;  %v624_v17 = vld [vmem:[#allocation2 + $0x58] sm:$0xff]  ;;  %v627_v19 = vld [vmem:[#allocation2 + $0x60] sm:$0xff]  ;;  %v630_v21 = vld [vmem:[#allocation2 + $0x68] sm:$0xff] }
  0x17   :  { %v633_v23 = vld [vmem:[#allocation2 + $0x70] sm:$0xff]  ;;  %v636_v25 = vld [vmem:[#allocation2 + $0x78] sm:$0xff]  ;;  %v639_v27 = vld [vmem:[#allocation2 + $0x80] sm:$0xff] }
  0x18   :  { %v62_v14 = vadd.f32 %v61_v10, %v608_v7  ;;  %v83_v16 = vadd.f32 %v82_v12, %v612_v9  ;;  %v642_v29 = vld [vmem:[#allocation2 + $0x88] sm:$0xff]  ;;  %v645_v31 = vld [vmem:[#allocation2 + $0x90] sm:$0xff]  ;;  %v648_v33 = vld [vmem:[#allocation2 + $0x98] sm:$0xff] }
  0x19   :  { %v651_v35 = vld [vmem:[#allocation2 + $0xa0] sm:$0xff]  ;;  %v654_v37 = vld [vmem:[#allocation2 + $0xa8] sm:$0xff]  ;;  %v657_v39 = vld [vmem:[#allocation2 + $0xb0] sm:$0xff] }
  0x1a   :  { %v63_v18 = vadd.f32 %v62_v14, %v615_v11  ;;  %v84_v20 = vadd.f32 %v83_v16, %v618_v13  ;;  %v660_v41 = vld [vmem:[#allocation2 + $0xb8] sm:$0xff]  ;;  %v663_v43 = vld [vmem:[#allocation2 + $0xc0] sm:$0xff]  ;;  %v666_v45 = vld [vmem:[#allocation2 + $0xc8] sm:$0xff] }
  0x1b   :  { %v669_v47 = vld [vmem:[#allocation2 + $0xd0] sm:$0xff]  ;;  %v672_v49 = vld [vmem:[#allocation2 + $0xd8] sm:$0xff]  ;;  %v675_v51 = vld [vmem:[#allocation2 + $0xe0] sm:$0xff] }
  0x1c   :  { %v64_v22 = vadd.f32 %v63_v18, %v621_v15  ;;  %v85_v24 = vadd.f32 %v84_v20, %v624_v17  ;;  %v678_v53 = vld [vmem:[#allocation2 + $0xe8] sm:$0xff]  ;;  %v681_v55 = vld [vmem:[#allocation2 + $0xf0] sm:$0xff]  ;;  %v684_v57 = vld [vmem:[#allocation2 + $0xf8] sm:$0xff] }
  0x1d   :  { %930 = vst [vmem:[#allocation5_spill] sm:$0xff] %v681_v55  ;;  %931 = vst [vmem:[#allocation6_spill] sm:$0xff] %v684_v57 }
  0x1e   :  { %v65_v26 = vadd.f32 %v64_v22, %v627_v19  ;;  %v86_v28 = vadd.f32 %v85_v24, %v630_v21 }
  0x20   :  { %v66_v30 = vadd.f32 %v65_v26, %v633_v23  ;;  %v87_v32 = vadd.f32 %v86_v28, %v636_v25 }
  0x22   :  { %v67_v34 = vadd.f32 %v66_v30, %v639_v27  ;;  %v88_v36 = vadd.f32 %v87_v32, %v642_v29 }
  0x24   :  { %v68_v38 = vadd.f32 %v67_v34, %v645_v31  ;;  %v89_v40 = vadd.f32 %v88_v36, %v648_v33 }
  0x26   :  { %v69_v42 = vadd.f32 %v68_v38, %v651_v35  ;;  %v90_v44 = vadd.f32 %v89_v40, %v654_v37 }
  0x28   :  { %v70_v46 = vadd.f32 %v69_v42, %v657_v39  ;;  %v91_v48 = vadd.f32 %v90_v44, %v660_v41 }
  0x2a   :  { %v71_v50 = vadd.f32 %v70_v46, %v663_v43  ;;  %v92_v52 = vadd.f32 %v91_v48, %v666_v45 }
  0x2c   :  { %v72_v54 = vadd.f32 %v71_v50, %v669_v47  ;;  %v93_v56 = vadd.f32 %v92_v52, %v672_v49 }
  0x2e   :  { %v73_v58 = vadd.f32 %v72_v54, %v675_v51  ;;  %v94_v59 = vadd.f32 %v93_v56, %v678_v53 }
  0x30   :  { %v74_v60 = vadd.f32 %v73_v58, %v681_v55  ;;  %v95_v61 = vadd.f32 %v94_v59, %v684_v57 }
  0x32   :  { %v75_v62 = vrot.slane %v74_v60, 4  ;;  %v96_v63 = vrot.slane %v95_v61, 4 }
  0x34   :  { %v76_v6 = vadd.f32 %v75_v62, %v74_v60  ;;  %v97_v8 = vadd.f32 %v96_v63, %v95_v61 }
  0x36   :  { %v77_v10 = vrot.slane %v76_v6, 2  ;;  %v98_v12 = vrot.slane %v97_v8, 2 }
  0x38   :  { %v78_v14 = vadd.f32 %v77_v10, %v76_v6  ;;  %v99_v16 = vadd.f32 %v98_v12, %v97_v8 }
  0x3a   :  { %v79_v18 = vrot.slane %v78_v14, 1  ;;  %v100_v20 = vrot.slane %v99_v16, 1 }
  0x3c   :  { %v80_v22 = vadd.f32 %v79_v18, %v78_v14  ;;  %v101_v24 = vadd.f32 %v100_v20, %v99_v16 }
  0x3e   :  { %v690_v26 = vmul.f32 0.0078125, %v80_v22  ;;  %v692_v28 = vmul.f32 0.0078125, %v101_v24 }
  0x40   :  { %v105_v30 = vsub.f32 %v594_v0, %v690_v26  ;;  %v106_v32 = vsub.f32 %v596_v1, %v692_v28  ;;  %v107_v34 = vsub.f32 %v598_v2, %v690_v26  ;;  %v108_v36 = vsub.f32 %v600_v3, %v692_v28 }
  0x41   :  { %v109_v38 = vsub.f32 %v602_v4, %v690_v26  ;;  %v110_v40 = vsub.f32 %v604_v5, %v692_v28  ;;  %v111_v42 = vsub.f32 %v608_v7, %v690_v26  ;;  %v112_v44 = vsub.f32 %v612_v9, %v692_v28 }
  0x42   :  { %v137_v46 = vmul.f32 %v105_v30, %v105_v30  ;;  %v138_v48 = vmul.f32 %v106_v32, %v106_v32  ;;  %v139_v50 = vmul.f32 %v107_v34, %v107_v34  ;;  %v140_v52 = vmul.f32 %v108_v36, %v108_v36 }
  0x43   :  { %v113_v54 = vsub.f32 %v615_v11, %v690_v26  ;;  %v114_v56 = vsub.f32 %v618_v13, %v692_v28  ;;  %v141_v58 = vmul.f32 %v109_v38, %v109_v38  ;;  %v142_v59 = vmul.f32 %v110_v40, %v110_v40 }
  0x44   :  { %v115_v60 = vsub.f32 %v621_v15, %v690_v26  ;;  %v116_v61 = vsub.f32 %v624_v17, %v692_v28  ;;  %v143_v62 = vmul.f32 %v111_v42, %v111_v42  ;;  %v144_v63 = vmul.f32 %v112_v44, %v112_v44 }
  0x45   :  { %v169_v6 = vadd.f32 %v139_v50, %v137_v46  ;;  %v190_v8 = vadd.f32 %v140_v52, %v138_v48  ;;  %v117_v10 = vsub.f32 %v627_v19, %v690_v26  ;;  %v118_v12 = vsub.f32 %v630_v21, %v692_v28 }
  0x46   :  { %v145_v14 = vmul.f32 %v113_v54, %v113_v54  ;;  %v146_v16 = vmul.f32 %v114_v56, %v114_v56  ;;  %v119_v22 = vsub.f32 %v633_v23, %v690_v26  ;;  %v120_v24 = vsub.f32 %v636_v25, %v692_v28 }
  0x47   :  { %v170_v18 = vadd.f32 %v169_v6, %v141_v58  ;;  %v191_v20 = vadd.f32 %v190_v8, %v142_v59  ;;  %v147_v30 = vmul.f32 %v115_v60, %v115_v60  ;;  %v148_v32 = vmul.f32 %v116_v61, %v116_v61 }
  0x48   :  { %v121_v38 = vsub.f32 %v639_v27, %v690_v26  ;;  %v122_v40 = vsub.f32 %v642_v29, %v692_v28  ;;  %v149_v42 = vmul.f32 %v117_v10, %v117_v10  ;;  %v150_v44 = vmul.f32 %v118_v12, %v118_v12 }
  0x49   :  { %v171_v34 = vadd.f32 %v170_v18, %v143_v62  ;;  %v192_v36 = vadd.f32 %v191_v20, %v144_v63  ;;  %v123_v50 = vsub.f32 %v645_v31, %v690_v26  ;;  %v124_v52 = vsub.f32 %v648_v33, %v692_v28 }
  0x4a   :  { %v151_v54 = vmul.f32 %v119_v22, %v119_v22  ;;  %v152_v56 = vmul.f32 %v120_v24, %v120_v24  ;;  %v125_v60 = vsub.f32 %v651_v35, %v690_v26  ;;  %v126_v61 = vsub.f32 %v654_v37, %v692_v28 }
  0x4b   :  { %v172_v46 = vadd.f32 %v171_v34, %v145_v14  ;;  %v193_v48 = vadd.f32 %v192_v36, %v146_v16  ;;  %v153_v62 = vmul.f32 %v121_v38, %v121_v38  ;;  %v154_v63 = vmul.f32 %v122_v40, %v122_v40 }
  0x4c   :  { %v127_v10 = vsub.f32 %v657_v39, %v690_v26  ;;  %v128_v12 = vsub.f32 %v660_v41, %v692_v28  ;;  %v155_v14 = vmul.f32 %v123_v50, %v123_v50  ;;  %v156_v16 = vmul.f32 %v124_v52, %v124_v52 }
  0x4d   :  { %v173_v58 = vadd.f32 %v172_v46, %v147_v30  ;;  %v194_v59 = vadd.f32 %v193_v48, %v148_v32  ;;  %v129_v22 = vsub.f32 %v663_v43, %v690_v26  ;;  %v130_v24 = vsub.f32 %v666_v45, %v692_v28 }
  0x4e   :  { %v157_v30 = vmul.f32 %v125_v60, %v125_v60  ;;  %v158_v32 = vmul.f32 %v126_v61, %v126_v61  ;;  %v131_v38 = vsub.f32 %v669_v47, %v690_v26  ;;  %v132_v40 = vsub.f32 %v672_v49, %v692_v28 }
  0x4f   :  { %v174_v6 = vadd.f32 %v173_v58, %v149_v42  ;;  %v195_v8 = vadd.f32 %v194_v59, %v150_v44  ;;  %v159_v42 = vmul.f32 %v127_v10, %v127_v10  ;;  %v160_v44 = vmul.f32 %v128_v12, %v128_v12 }
  0x50   :  { %v133_v50 = vsub.f32 %v675_v51, %v690_v26  ;;  %v134_v52 = vsub.f32 %v678_v53, %v692_v28  ;;  %v135_v60 = vsub.f32 %v681_v55, %v690_v26  ;;  %v136_v61 = vsub.f32 %v684_v57, %v692_v28 }
  0x51   :  { %v175_v18 = vadd.f32 %v174_v6, %v151_v54  ;;  %v196_v20 = vadd.f32 %v195_v8, %v152_v56  ;;  %v161_v54 = vmul.f32 %v129_v22, %v129_v22  ;;  %v162_v56 = vmul.f32 %v130_v24, %v130_v24 }
  0x52   :  { %v165_v10 = vmul.f32 %v133_v50, %v133_v50  ;;  %v166_v12 = vmul.f32 %v134_v52, %v134_v52 }
  0x53   :  { %v176_v34 = vadd.f32 %v175_v18, %v153_v62  ;;  %v197_v36 = vadd.f32 %v196_v20, %v154_v63  ;;  %v163_v62 = vmul.f32 %v131_v38, %v131_v38  ;;  %v164_v63 = vmul.f32 %v132_v40, %v132_v40 }
  0x54   :  { %v167_v18 = vmul.f32 %v135_v60, %v135_v60  ;;  %v168_v20 = vmul.f32 %v136_v61, %v136_v61 }
  0x55   :  { %v177_v46 = vadd.f32 %v176_v34, %v155_v14  ;;  %v198_v48 = vadd.f32 %v197_v36, %v156_v16 }
  0x57   :  { %v178_v58 = vadd.f32 %v177_v46, %v157_v30  ;;  %v199_v59 = vadd.f32 %v198_v48, %v158_v32 }
  0x59   :  { %v179_v6 = vadd.f32 %v178_v58, %v159_v42  ;;  %v200_v8 = vadd.f32 %v199_v59, %v160_v44 }
  0x5b   :  { %v180_v14 = vadd.f32 %v179_v6, %v161_v54  ;;  %v201_v16 = vadd.f32 %v200_v8, %v162_v56  ;;  %v224_v6 = vlaneseq }
  0x5d   :  { %v181_v22 = vadd.f32 %v180_v14, %v163_v62  ;;  %v202_v24 = vadd.f32 %v201_v16, %v164_v63  ;;  %v561_v62 = vmov 1966171168  }
  0x5e   :  { %v222_v63 = vunpack.c.l.s4 %v561_v62 }
  0x5f   :  { %v182_v30 = vadd.f32 %v181_v22, %v165_v10  ;;  %v203_v32 = vadd.f32 %v202_v24, %v166_v12  ;;  %v225_v10 = vshrl.u32 %v224_v6, 7 }
  0x60   :  { %v223_v8 = vunpack.c.0.s8 %v222_v63 }
  0x61   :  { %v183_v34 = vadd.f32 %v182_v30, %v167_v18  ;;  %v204_v36 = vadd.f32 %v203_v32, %v168_v20  ;;  %v213_v18 = vld [vmem:[%s925_s1] sm:$0x3]  ;;  %v241_v22 = vsub.s32 0, %v225_v10  ;;  %v245_v24 = vsub.s32 1, %v225_v10 }
  0x62   :  { %v226_v14 = vsub.s32 %v223_v8, %v225_v10 }
  0x63   :  { %v184_v46 = vrot.slane %v183_v34, 4  ;;  %v205_v48 = vrot.slane %v204_v36, 4 }
  0x65   :  { %v185_v55 = vadd.f32 %v184_v46, %v183_v34  ;;  %v206_v57 = vadd.f32 %v205_v48, %v204_v36 }
  0x67   :  { %v186_v38 = vrot.slane %v185_v55, 2  ;;  %v207_v40 = vrot.slane %v206_v57, 2 }
  0x69   :  { %v187_v42 = vadd.f32 %v186_v38, %v185_v55  ;;  %v208_v44 = vadd.f32 %v207_v40, %v206_v57 }
  0x6b   :  { %v188_v50 = vrot.slane %v187_v42, 1  ;;  %v209_v52 = vrot.slane %v208_v44, 1 }
  0x6d   :  { %v189_v54 = vadd.f32 %v188_v50, %v187_v42  ;;  %v210_v56 = vadd.f32 %v209_v52, %v208_v44 }
  0x6f   :  { %v211_v58 = vmul.f32 0.0078125, %v189_v54  ;;  %v212_v59 = vmul.f32 0.0078125, %v210_v56 }
  0x71   :  { %v214_v60 = vadd.f32 1e-05, %v211_v58  ;;  %v215_v61 = vadd.f32 1e-05, %v212_v59 }
  0x73   :  { %530 = vrsqrt.f32 %v214_v60 }
  0x74   :  { %532 = vrsqrt.f32 %v215_v61 }
  0x7d   :  { %v531_v12 = vpop.eup %530 }
  0x7e   :  { %v533_v16 = vpop.eup %532 }
  0x7f   :  { %v220_v55 = vcombine.low %v531_v12, %v533_v16 }
  0x81   :  { %v227_v57 = vrot.slane %v220_v55, %v226_v14 }
  0x83   :  { %v234_v20 = vrot.slane %v227_v57, %v226_v14 }
  0x85   :  { %v236_v30 = vmul.f32 %v234_v20, %v213_v18 }
  0x87   :  { %v242_v32 = vrot.slane %v236_v30, %v241_v22  ;;  %v246_v34 = vrot.slane %v236_v30, %v245_v24 }
  0x89   :  { %v249_v36 = vmul.f32 %v242_v32, %v690_v26  ;;  %v250_v46 = vmul.f32 %v246_v34, %v692_v28  ;;  %v270_v38 = vmul.f32 %v242_v32, %v594_v0  ;;  %v271_v40 = vmul.f32 %v246_v34, %v596_v1  ;;  %v237_v28 = vld [vmem:[%s926_s2] sm:$0x3] }
  0x8a   :  { %v272_v42 = vmul.f32 %v242_v32, %v598_v2  ;;  %v273_v44 = vmul.f32 %v246_v34, %v600_v3  ;;  %v274_v50 = vmul.f32 %v242_v32, %v602_v4  ;;  %v275_v54 = vmul.f32 %v246_v34, %v604_v5 }
  0x8b   :  { %v253_v48 = vcombine.low %v249_v36, %v250_v46  ;;  %v276_v56 = vmul.f32 %v242_v32, %v608_v7  ;;  %v277_v26 = vmul.f32 %v246_v34, %v612_v9  ;;  %v278_v0 = vmul.f32 %v242_v32, %v615_v11 }
  0x8c   :  { %v279_v1 = vmul.f32 %v246_v34, %v618_v13  ;;  %v280_v2 = vmul.f32 %v242_v32, %v621_v15  ;;  %v281_v3 = vmul.f32 %v246_v34, %v624_v17  ;;  %v282_v58 = vmul.f32 %v242_v32, %v627_v19 }
  0x8d   :  { %v260_v52 = vrot.slane %v253_v48, %v226_v14  ;;  %v283_v5 = vmul.f32 %v246_v34, %v630_v21  ;;  %v284_v7 = vmul.f32 %v242_v32, %v633_v23  ;;  %v285_v9 = vmul.f32 %v246_v34, %v636_v25 }
  0x8e   :  { %v286_v59 = vmul.f32 %v242_v32, %v639_v27  ;;  %v287_v60 = vmul.f32 %v246_v34, %v642_v29  ;;  %v785_v11 = vmul.f32 %v242_v32, %v645_v31  ;;  %v788_v15 = vmul.f32 %v246_v34, %v648_v33 }
  0x8f   :  { %v267_v4 = vrot.slane %v260_v52, %v226_v14  ;;  %v791_v17 = vmul.f32 %v242_v32, %v651_v35  ;;  %v794_v19 = vmul.f32 %v246_v34, %v654_v37  ;;  %v797_v21 = vmul.f32 %v242_v32, %v657_v39 }
  0x90   :  { %v800_v23 = vmul.f32 %v246_v34, %v660_v41  ;;  %v803_v25 = vmul.f32 %v242_v32, %v663_v43  ;;  %v806_v27 = vmul.f32 %v246_v34, %v666_v45  ;;  %v813_v33 = vmul.f32 %v242_v32, %v669_v47  ;;  %v932_v41 = vld [vmem:[#allocation5_spill] sm:$0xff]  ;;  %v933_v45 = vld [vmem:[#allocation6_spill] sm:$0xff] }
  0x91   :  { %v269_v13 = vsub.f32 %v237_v28, %v267_v4  ;;  %v816_v35 = vmul.f32 %v246_v34, %v672_v49  ;;  %v819_v37 = vmul.f32 %v242_v32, %v675_v51  ;;  %v822_v39 = vmul.f32 %v246_v34, %v678_v53 }
  0x92   :  { %v825_v43 = vmul.f32 %v242_v32, %v932_v41  ;;  %v828_v61 = vmul.f32 %v246_v34, %v933_v45 }
  0x93   :  { %v808_v29 = vrot.slane %v269_v13, %v241_v22  ;;  %v810_v31 = vrot.slane %v269_v13, %v245_v24 }
  0x95   :  { %v313_v62 = vadd.f32 %v808_v29, %v270_v38  ;;  %v314_v47 = vadd.f32 %v810_v31, %v271_v40  ;;  %v315_v63 = vadd.f32 %v808_v29, %v272_v42  ;;  %v316_v49 = vadd.f32 %v810_v31, %v273_v44 }
  0x96   :  { %v317_v51 = vadd.f32 %v808_v29, %v274_v50  ;;  %v318_v6 = vadd.f32 %v810_v31, %v275_v54  ;;  %v319_v53 = vadd.f32 %v808_v29, %v276_v56  ;;  %v320_v8 = vadd.f32 %v810_v31, %v277_v26 }
  0x97   :  { %v345_v10 = vmax.f32 %v313_v62, 0.0  ;;  %v346_v12 = vmax.f32 %v314_v47, 0.0  ;;  %v347_v14 = vmax.f32 %v315_v63, 0.0  ;;  %v348_v16 = vmax.f32 %v316_v49, 0.0 }
  0x98   :  { %v349_v55 = vmax.f32 %v317_v51, 0.0  ;;  %v350_v57 = vmax.f32 %v318_v6, 0.0  ;;  %v351_v18 = vmax.f32 %v319_v53, 0.0  ;;  %v352_v20 = vmax.f32 %v320_v8, 0.0 }
  0x99   :  { %v510_v22 = vpack.c.bf16 %v346_v12, %v345_v10  ;;  %v511_v24 = vpack.c.bf16 %v348_v16, %v347_v14  ;;  %v321_v30 = vadd.f32 %v808_v29, %v278_v0  ;;  %v322_v32 = vadd.f32 %v810_v31, %v279_v1 }
  0x9a   :  { %v512_v34 = vpack.c.bf16 %v350_v57, %v349_v55  ;;  %v513_v36 = vpack.c.bf16 %v352_v20, %v351_v18  ;;  %v323_v46 = vadd.f32 %v808_v29, %v280_v2  ;;  %v324_v48 = vadd.f32 %v810_v31, %v281_v3 }
  0x9b   :  { %473 = vst [vmem:[%s927_s3] sm:$0xff] %v510_v22  ;;  %474 = vst [vmem:[%s927_s3 + $0x8] sm:$0xff] %v511_v24  ;;  %v353_v38 = vmax.f32 %v321_v30, 0.0  ;;  %v354_v40 = vmax.f32 %v322_v32, 0.0  ;;  %v325_v42 = vadd.f32 %v808_v29, %v282_v58  ;;  %v326_v44 = vadd.f32 %v810_v31, %v283_v5 }
  0x9c   :  { %475 = vst [vmem:[%s927_s3 + $0x10] sm:$0xff] %v512_v34  ;;  %476 = vst [vmem:[%s927_s3 + $0x18] sm:$0xff] %v513_v36  ;;  %v355_v50 = vmax.f32 %v323_v46, 0.0  ;;  %v356_v52 = vmax.f32 %v324_v48, 0.0  ;;  %v327_v54 = vadd.f32 %v808_v29, %v284_v7  ;;  %v328_v56 = vadd.f32 %v810_v31, %v285_v9 }
  0x9d   :  { %v514_v26 = vpack.c.bf16 %v354_v40, %v353_v38  ;;  %v357_v28 = vmax.f32 %v325_v42, 0.0  ;;  %v358_v0 = vmax.f32 %v326_v44, 0.0  ;;  %v329_v1 = vadd.f32 %v808_v29, %v286_v59 }
  0x9e   :  { %v515_v2 = vpack.c.bf16 %v356_v52, %v355_v50  ;;  %v359_v3 = vmax.f32 %v327_v54, 0.0  ;;  %v360_v4 = vmax.f32 %v328_v56, 0.0  ;;  %v330_v58 = vadd.f32 %v810_v31, %v287_v60 }
  0x9f   :  { %477 = vst [vmem:[%s927_s3 + $0x20] sm:$0xff] %v514_v26  ;;  %v516_v5 = vpack.c.bf16 %v358_v0, %v357_v28  ;;  %v361_v13 = vmax.f32 %v329_v1, 0.0  ;;  %v331_v7 = vadd.f32 %v808_v29, %v785_v11  ;;  %v332_v9 = vadd.f32 %v810_v31, %v788_v15 }
  0xa0   :  { %478 = vst [vmem:[%s927_s3 + $0x28] sm:$0xff] %v515_v2  ;;  %v517_v59 = vpack.c.bf16 %v360_v4, %v359_v3  ;;  %v362_v41 = vmax.f32 %v330_v58, 0.0  ;;  %v333_v60 = vadd.f32 %v808_v29, %v791_v17  ;;  %v334_v45 = vadd.f32 %v810_v31, %v794_v19 }
  0xa1   :  { %479 = vst [vmem:[%s927_s3 + $0x30] sm:$0xff] %v516_v5  ;;  %v363_v11 = vmax.f32 %v331_v7, 0.0  ;;  %v364_v62 = vmax.f32 %v332_v9, 0.0  ;;  %v335_v15 = vadd.f32 %v808_v29, %v797_v21  ;;  %v336_v47 = vadd.f32 %v810_v31, %v800_v23 }
  0xa2   :  { %480 = vst [vmem:[%s927_s3 + $0x38] sm:$0xff] %v517_v59  ;;  %v518_v17 = vpack.c.bf16 %v362_v41, %v361_v13  ;;  %v365_v63 = vmax.f32 %v333_v60, 0.0  ;;  %v366_v49 = vmax.f32 %v334_v45, 0.0  ;;  %v337_v19 = vadd.f32 %v808_v29, %v803_v25 }
  0xa3   :  { %v519_v51 = vpack.c.bf16 %v364_v62, %v363_v11  ;;  %v367_v6 = vmax.f32 %v335_v15, 0.0  ;;  %v368_v53 = vmax.f32 %v336_v47, 0.0  ;;  %v338_v8 = vadd.f32 %v810_v31, %v806_v27 }
  0xa4   :  { %481 = vst [vmem:[%s927_s3 + $0x40] sm:$0xff] %v518_v17  ;;  %v520_v21 = vpack.c.bf16 %v366_v49, %v365_v63  ;;  %v369_v23 = vmax.f32 %v337_v19, 0.0  ;;  %v339_v10 = vadd.f32 %v808_v29, %v813_v33  ;;  %v340_v12 = vadd.f32 %v810_v31, %v816_v35 }
  0xa5   :  { %482 = vst [vmem:[%s927_s3 + $0x48] sm:$0xff] %v519_v51  ;;  %v521_v25 = vpack.c.bf16 %v368_v53, %v367_v6  ;;  %v370_v14 = vmax.f32 %v338_v8, 0.0  ;;  %v341_v27 = vadd.f32 %v808_v29, %v819_v37  ;;  %v342_v16 = vadd.f32 %v810_v31, %v822_v39 }
  0xa6   :  { %483 = vst [vmem:[%s927_s3 + $0x50] sm:$0xff] %v520_v21  ;;  %v371_v33 = vmax.f32 %v339_v10, 0.0  ;;  %v372_v55 = vmax.f32 %v340_v12, 0.0  ;;  %v343_v35 = vadd.f32 %v808_v29, %v825_v43  ;;  %v344_v57 = vadd.f32 %v810_v31, %v828_v61 }
  0xa7   :  { %484 = vst [vmem:[%s927_s3 + $0x58] sm:$0xff] %v521_v25  ;;  %v522_v37 = vpack.c.bf16 %v370_v14, %v369_v23  ;;  %v373_v18 = vmax.f32 %v341_v27, 0.0  ;;  %v374_v20 = vmax.f32 %v342_v16, 0.0 }
  0xa8   :  { %v523_v39 = vpack.c.bf16 %v372_v55, %v371_v33  ;;  %v375_v22 = vmax.f32 %v343_v35, 0.0  ;;  %v376_v24 = vmax.f32 %v344_v57, 0.0 }
  0xa9   :  { %485 = vst [vmem:[%s927_s3 + $0x60] sm:$0xff] %v522_v37  ;;  %v524_v30 = vpack.c.bf16 %v374_v20, %v373_v18 }
  0xaa   :  { %486 = vst [vmem:[%s927_s3 + $0x68] sm:$0xff] %v523_v39  ;;  %v525_v29 = vpack.c.bf16 %v376_v24, %v375_v22 }
  0xab   :  { %487 = vst [vmem:[%s927_s3 + $0x70] sm:$0xff] %v524_v30 }
  0xac   :  { %488 = vst [vmem:[%s927_s3 + $0x78] sm:$0xff] %v525_v29 }
  0xad   :  { %493 = vsyncpa [#allocation3], 1 }

// kernel: bn_relu_conv1x1_bn.3
= control target key start
LH: loop header
LB: loop body
LE: loop exit
PB: predicated region body
PF: predicated region fallthrough
CT: control target
= control target key end

     0   :  { %s1325_s0 = inlined_call_operand.vmem [shape: bf16[128,256], index: 0, kind: input, shape index: {}]   ;;  %s1326_s1 = inlined_call_operand.vmem [shape: bf16[256,256], index: 1, kind: input, shape index: {}]   ;;  %s1327_s2 = inlined_call_operand.vmem [shape: f32[1,256], index: 2, kind: input, shape index: {}]   ;;  %s1328_s3 = inlined_call_operand.vmem [shape: f32[1,256], index: 3, kind: input, shape index: {}]   ;;  %s1329_s4 = inlined_call_operand.hbm [shape: f32[128,256], index: 4, kind: output, shape index: {}]  }
   0x1   :  { %v836_v0 = vld [vmem:[%s1326_s1 + $0x4] ss:$8 sps:$4 sm:$0xff]   ;;  %v838_v1 = vld [vmem:[%s1326_s1] ss:$8 sps:$4 sm:$0xff]   ;;  %v839_v2 = vld [vmem:[%s1326_s1 + $0x14] ss:$8 sps:$4 sm:$0xff]  }
   0x2   :  { %306 = vmatprep.subr.bf16.mxu0 %v836_v0  ;;  %800 = vmatprep.subr.bf16.mxu1 %v836_v0  ;;  %v841_v3 = vld [vmem:[%s1326_s1 + $0x10] ss:$8 sps:$4 sm:$0xff]   ;;  %v842_v4 = vld [vmem:[%s1326_s1 + $0x24] ss:$8 sps:$4 sm:$0xff]   ;;  %v844_v5 = vld [vmem:[%s1326_s1 + $0x20] ss:$8 sps:$4 sm:$0xff]  }
   0x3   :  { %307 = vmatpush1.bf16.msra.mxu0 %v838_v1  ;;  %816 = vmatpush1.bf16.msra.mxu1 %v838_v1  ;;  %v845_v6 = vld [vmem:[%s1326_s1 + $0x34] ss:$8 sps:$4 sm:$0xff]   ;;  %v847_v7 = vld [vmem:[%s1326_s1 + $0x30] ss:$8 sps:$4 sm:$0xff]   ;;  %v848_v8 = vld [vmem:[%s1326_s1 + $0x44] ss:$8 sps:$4 sm:$0xff]  }
   0x4   :  { %308 = vmatprep.subr.bf16.mxu0 %v839_v2  ;;  %801 = vmatprep.subr.bf16.mxu1 %v839_v2  ;;  %v850_v9 = vld [vmem:[%s1326_s1 + $0x40] ss:$8 sps:$4 sm:$0xff]   ;;  %v851_v10 = vld [vmem:[%s1326_s1 + $0x54] ss:$8 sps:$4 sm:$0xff]   ;;  %v853_v11 = vld [vmem:[%s1326_s1 + $0x50] ss:$8 sps:$4 sm:$0xff]  }
   0x5   :  { %v854_v12 = vld [vmem:[%s1326_s1 + $0x64] ss:$8 sps:$4 sm:$0xff]   ;;  %v856_v14 = vld [vmem:[%s1326_s1 + $0x60] ss:$8 sps:$4 sm:$0xff]   ;;  %v857_v15 = vld [vmem:[%s1326_s1 + $0x74] ss:$8 sps:$4 sm:$0xff]  }
   0x6   :  { %v886_v13 = vld [vmem:[%s1325_s0 + $0x4] ss:$8 sps:$4 sm:$0xff]   ;;  %v859_v17 = vld [vmem:[%s1326_s1 + $0x70] ss:$8 sps:$4 sm:$0xff]   ;;  %v862_v19 = vld [vmem:[%s1326_s1 + $0x80] ss:$8 sps:$4 sm:$0xff]  }
   0x7   :  { %309 = vmatpush1.bf16.msra.mxu0 %v841_v3  ;;  %817 = vmatpush1.bf16.msra.mxu1 %v841_v3  ;;  %v892_v16 = vld [vmem:[%s1325_s0 + $0x44] ss:$8 sps:$4 sm:$0xff]   ;;  %v863_v20 = vld [vmem:[%s1326_s1 + $0x94] ss:$8 sps:$4 sm:$0xff]  }
   0x8   :  { %310 = vmatprep.subr.bf16.mxu0 %v842_v4  ;;  %802 = vmatprep.subr.bf16.mxu1 %v842_v4  ;;  %v860_v18 = vld [vmem:[%s1326_s1 + $0x84] ss:$8 sps:$4 sm:$0xff]  }
   0x9   :  { %338 = vmatprep.mubr.bf16.mxu0 %v886_v13  ;;  %378 = vmatprep.mubr.bf16.mxu1 %v892_v16 }
   0xb   :  { %311 = vmatpush1.bf16.msra.mxu0 %v844_v5  ;;  %818 = vmatpush1.bf16.msra.mxu1 %v844_v5 }
   0xc   :  { %312 = vmatprep.subr.bf16.mxu0 %v845_v6  ;;  %803 = vmatprep.subr.bf16.mxu1 %v845_v6 }
   0xf   :  { %313 = vmatpush1.bf16.msra.mxu0 %v847_v7  ;;  %819 = vmatpush1.bf16.msra.mxu1 %v847_v7 }
  0x10   :  { %314 = vmatprep.subr.bf16.mxu0 %v848_v8  ;;  %804 = vmatprep.subr.bf16.mxu1 %v848_v8 }
  0x13   :  { %315 = vmatpush1.bf16.msra.mxu0 %v850_v9  ;;  %820 = vmatpush1.bf16.msra.mxu1 %v850_v9 }
  0x14   :  { %316 = vmatprep.subr.bf16.mxu0 %v851_v10  ;;  %805 = vmatprep.subr.bf16.mxu1 %v851_v10 }
  0x17   :  { %317 = vmatpush1.bf16.msra.mxu0 %v853_v11  ;;  %821 = vmatpush1.bf16.msra.mxu1 %v853_v11 }
  0x18   :  { %318 = vmatprep.subr.bf16.mxu0 %v854_v12  ;;  %806 = vmatprep.subr.bf16.mxu1 %v854_v12 }
  0x1b   :  { %319 = vmatpush1.bf16.msra.mxu0 %v856_v14  ;;  %822 = vmatpush1.bf16.msra.mxu1 %v856_v14 }
  0x1c   :  { %320 = vmatprep.subr.bf16.mxu0 %v857_v15  ;;  %807 = vmatprep.subr.bf16.mxu1 %v857_v15 }
  0x1f   :  { %321 = vmatpush1.bf16.msra.mxu0 %v859_v17  ;;  %823 = vmatpush1.bf16.msra.mxu1 %v859_v17 }
  0x20   :  { %322 = vmatprep.subr.bf16.mxu0 %v860_v18  ;;  %808 = vmatprep.subr.bf16.mxu1 %v860_v18 }
  0x21   :  { %9 = vsyncpa [#allocation3], 0  ;;  %v865_v21 = vld [vmem:[%s1326_s1 + $0x90] ss:$8 sps:$4 sm:$0xff]   ;;  %v866_v22 = vld [vmem:[%s1326_s1 + $0xa4] ss:$8 sps:$4 sm:$0xff]  }
  0x22   :  { %v868_v23 = vld [vmem:[%s1326_s1 + $0xa0] ss:$8 sps:$4 sm:$0xff]   ;;  %v869_v24 = vld [vmem:[%s1326_s1 + $0xb4] ss:$8 sps:$4 sm:$0xff]   ;;  %v871_v25 = vld [vmem:[%s1326_s1 + $0xb0] ss:$8 sps:$4 sm:$0xff]  }
  0x23   :  { %323 = vmatpush1.bf16.msra.mxu0 %v862_v19  ;;  %824 = vmatpush1.bf16.msra.mxu1 %v862_v19  ;;  %v872_v26 = vld [vmem:[%s1326_s1 + $0xc4] ss:$8 sps:$4 sm:$0xff]   ;;  %v874_v27 = vld [vmem:[%s1326_s1 + $0xc0] ss:$8 sps:$4 sm:$0xff]   ;;  %v875_v28 = vld [vmem:[%s1326_s1 + $0xd4] ss:$8 sps:$4 sm:$0xff]  }
  0x24   :  { %324 = vmatprep.subr.bf16.mxu0 %v863_v20  ;;  %809 = vmatprep.subr.bf16.mxu1 %v863_v20  ;;  %v877_v29 = vld [vmem:[%s1326_s1 + $0xd0] ss:$8 sps:$4 sm:$0xff]   ;;  %v878_v30 = vld [vmem:[%s1326_s1 + $0xe4] ss:$8 sps:$4 sm:$0xff]   ;;  %v880_v31 = vld [vmem:[%s1326_s1 + $0xe0] ss:$8 sps:$4 sm:$0xff]  }
  0x25   :  { %v881_v32 = vld [vmem:[%s1326_s1 + $0xf4] ss:$8 sps:$4 sm:$0xff]   ;;  %v883_v33 = vld [vmem:[%s1326_s1 + $0xf0] ss:$8 sps:$4 sm:$0xff]   ;;  %v884_v34 = vld [vmem:[%s1325_s0] ss:$8 sps:$4 sm:$0xff]  }
  0x26   :  { %v890_v35 = vld [vmem:[%s1325_s0 + $0x40] ss:$8 sps:$4 sm:$0xff]   ;;  %v887_v36 = vld [vmem:[%s1325_s0 + $0x14] ss:$8 sps:$4 sm:$0xff]   ;;  %v889_v38 = vld [vmem:[%s1325_s0 + $0x10] ss:$8 sps:$4 sm:$0xff]  }
  0x27   :  { %325 = vmatpush1.bf16.msra.mxu0 %v865_v21  ;;  %825 = vmatpush1.bf16.msra.mxu1 %v865_v21  ;;  %v896_v37 = vld [vmem:[%s1325_s0 + $0x54] ss:$8 sps:$4 sm:$0xff]   ;;  %v898_v39 = vld [vmem:[%s1325_s0 + $0x50] ss:$8 sps:$4 sm:$0xff]   ;;  %v893_v40 = vld [vmem:[%s1325_s0 + $0x24] ss:$8 sps:$4 sm:$0xff]  }
  0x28   :  { %326 = vmatprep.subr.bf16.mxu0 %v866_v22  ;;  %810 = vmatprep.subr.bf16.mxu1 %v866_v22  ;;  %v902_v41 = vld [vmem:[%s1325_s0 + $0x64] ss:$8 sps:$4 sm:$0xff]   ;;  %v895_v42 = vld [vmem:[%s1325_s0 + $0x20] ss:$8 sps:$4 sm:$0xff]   ;;  %v899_v44 = vld [vmem:[%s1325_s0 + $0x34] ss:$8 sps:$4 sm:$0xff]  }
  0x29   :  { %v904_v43 = vld [vmem:[%s1325_s0 + $0x60] ss:$8 sps:$4 sm:$0xff]   ;;  %v905_v45 = vld [vmem:[%s1325_s0 + $0x74] ss:$8 sps:$4 sm:$0xff]   ;;  %v901_v46 = vld [vmem:[%s1325_s0 + $0x30] ss:$8 sps:$4 sm:$0xff]  }
  0x2a   :  { %v907_v47 = vld [vmem:[%s1325_s0 + $0x70] ss:$8 sps:$4 sm:$0xff]  }
  0x2b   :  { %327 = vmatpush1.bf16.msra.mxu0 %v868_v23  ;;  %826 = vmatpush1.bf16.msra.mxu1 %v868_v23 }
  0x2c   :  { %328 = vmatprep.subr.bf16.mxu0 %v869_v24  ;;  %811 = vmatprep.subr.bf16.mxu1 %v869_v24 }
  0x2f   :  { %329 = vmatpush1.bf16.msra.mxu0 %v871_v25  ;;  %827 = vmatpush1.bf16.msra.mxu1 %v871_v25 }
  0x30   :  { %330 = vmatprep.subr.bf16.mxu0 %v872_v26  ;;  %812 = vmatprep.subr.bf16.mxu1 %v872_v26 }
  0x33   :  { %331 = vmatpush1.bf16.msra.mxu0 %v874_v27  ;;  %828 = vmatpush1.bf16.msra.mxu1 %v874_v27 }
  0x34   :  { %332 = vmatprep.subr.bf16.mxu0 %v875_v28  ;;  %813 = vmatprep.subr.bf16.mxu1 %v875_v28 }
  0x37   :  { %333 = vmatpush1.bf16.msra.mxu0 %v877_v29  ;;  %829 = vmatpush1.bf16.msra.mxu1 %v877_v29 }
  0x38   :  { %334 = vmatprep.subr.bf16.mxu0 %v878_v30  ;;  %814 = vmatprep.subr.bf16.mxu1 %v878_v30 }
  0x3b   :  { %335 = vmatpush1.bf16.msra.mxu0 %v880_v31  ;;  %830 = vmatpush1.bf16.msra.mxu1 %v880_v31 }
  0x3c   :  { %336 = vmatprep.subr.bf16.mxu0 %v881_v32  ;;  %815 = vmatprep.subr.bf16.mxu1 %v881_v32 }
  0x3f   :  { %337 = vmatpush1.bf16.msra.mxu0 %v883_v33  ;;  %831 = vmatpush1.bf16.msra.mxu1 %v883_v33 }
  0x42   :  { %339 = vmatmul.mubr.bf16.vlgmr.msra.gmra.mrb[0].mxu0 %v884_v34  ;;  %379 = vmatmul.mubr.bf16.vlgmr.msra.gmra.mrb[0].mxu1 %v890_v35 }
  0x43   :  { %348 = vmatprep.mubr.bf16.mxu0 %v887_v36  ;;  %388 = vmatprep.mubr.bf16.mxu1 %v896_v37 }
  0x4a   :  { %349 = vmatmul.mubr.bf16.gmra.mrb[4].mxu0 %v889_v38  ;;  %389 = vmatmul.mubr.bf16.gmra.mrb[4].mxu1 %v898_v39 }
  0x4b   :  { %358 = vmatprep.mubr.bf16.mxu0 %v893_v40  ;;  %398 = vmatprep.mubr.bf16.mxu1 %v902_v41 }
  0x52   :  { %359 = vmatmul.mubr.bf16.gmra.mrb[8].mxu0 %v895_v42  ;;  %399 = vmatmul.mubr.bf16.gmra.mrb[8].mxu1 %v904_v43 }
  0x53   :  { %368 = vmatprep.mubr.bf16.mxu0 %v899_v44  ;;  %408 = vmatprep.mubr.bf16.mxu1 %v905_v45 }
  0x5a   :  { %369 = vmatmul.mubr.bf16.gmra.mrb[12].mxu0 %v901_v46  ;;  %409 = vmatmul.mubr.bf16.gmra.mrb[12].mxu1 %v907_v47 }
 0x115   :  { %v1109_v48 = vpop.f32.mrb[0].mxu0  ;;  %v1111_v49 = vpop.f32.mrb[0].mxu1 }
 0x116   :  { %v1113_v50 = vpop.f32.mrb[1].mxu0  ;;  %v1115_v51 = vpop.f32.mrb[1].mxu1 }
 0x117   :  { %v1117_v52 = vpop.f32.mrb[2].mxu0  ;;  %v1119_v53 = vpop.f32.mrb[2].mxu1 }
 0x118   :  { %v419_v54 = vadd.f32 %v1117_v52, %v1109_v48  ;;  %v1123_v55 = vpop.f32.mrb[3].mxu0  ;;  %v1125_v56 = vpop.f32.mrb[3].mxu1 }
 0x119   :  { %v440_v57 = vadd.f32 %v1123_v55, %v1113_v50 }
 0x11d   :  { %v1129_v58 = vpop.f32.mrb[4].mxu0  ;;  %v1131_v59 = vpop.f32.mrb[4].mxu1 }
 0x11e   :  { %v420_v60 = vadd.f32 %v419_v54, %v1129_v58  ;;  %v1134_v61 = vpop.f32.mrb[5].mxu0  ;;  %v1136_v62 = vpop.f32.mrb[5].mxu1 }
 0x11f   :  { %v441_v63 = vadd.f32 %v440_v57, %v1134_v61  ;;  %v1139_v0 = vpop.f32.mrb[6].mxu0  ;;  %v1141_v1 = vpop.f32.mrb[6].mxu1 }
 0x120   :  { %v421_v2 = vadd.f32 %v420_v60, %v1139_v0  ;;  %v1144_v3 = vpop.f32.mrb[7].mxu0  ;;  %v1146_v4 = vpop.f32.mrb[7].mxu1 }
 0x121   :  { %v442_v5 = vadd.f32 %v441_v63, %v1144_v3 }
 0x125   :  { %v1149_v6 = vpop.f32.mrb[8].mxu0  ;;  %v1151_v7 = vpop.f32.mrb[8].mxu1 }
 0x126   :  { %v422_v8 = vadd.f32 %v421_v2, %v1149_v6  ;;  %v1154_v9 = vpop.f32.mrb[9].mxu0  ;;  %v1156_v10 = vpop.f32.mrb[9].mxu1 }
 0x127   :  { %v443_v11 = vadd.f32 %v442_v5, %v1154_v9  ;;  %v1159_v12 = vpop.f32.mrb[10].mxu0  ;;  %v1161_v13 = vpop.f32.mrb[10].mxu1 }
 0x128   :  { %v423_v14 = vadd.f32 %v422_v8, %v1159_v12  ;;  %v1164_v15 = vpop.f32.mrb[11].mxu0  ;;  %v1166_v16 = vpop.f32.mrb[11].mxu1 }
 0x129   :  { %v444_v17 = vadd.f32 %v443_v11, %v1164_v15 }
 0x12d   :  { %v1169_v18 = vpop.f32.mrb[12].mxu0  ;;  %v1171_v19 = vpop.f32.mrb[12].mxu1 }
 0x12e   :  { %v424_v20 = vadd.f32 %v423_v14, %v1169_v18  ;;  %v1174_v21 = vpop.f32.mrb[13].mxu0  ;;  %v1176_v22 = vpop.f32.mrb[13].mxu1 }
 0x12f   :  { %v445_v23 = vadd.f32 %v444_v17, %v1174_v21  ;;  %v1179_v24 = vpop.f32.mrb[14].mxu0  ;;  %v1181_v25 = vpop.f32.mrb[14].mxu1 }
 0x130   :  { %v425_v26 = vadd.f32 %v424_v20, %v1179_v24  ;;  %v1184_v27 = vpop.f32.mrb[15].mxu0  ;;  %v1186_v28 = vpop.f32.mrb[15].mxu1 }
 0x131   :  { %v446_v29 = vadd.f32 %v445_v23, %v1184_v27 }
 0x132   :  { %v426_v30 = vadd.f32 %v425_v26, %v1111_v49 }
 0x133   :  { %v447_v31 = vadd.f32 %v446_v29, %v1115_v51 }
 0x134   :  { %v427_v32 = vadd.f32 %v426_v30, %v1119_v53 }
 0x135   :  { %v448_v33 = vadd.f32 %v447_v31, %v1125_v56 }
 0x136   :  { %v428_v34 = vadd.f32 %v427_v32, %v1131_v59 }
 0x137   :  { %v449_v35 = vadd.f32 %v448_v33, %v1136_v62 }
 0x138   :  { %v429_v36 = vadd.f32 %v428_v34, %v1141_v1 }
 0x139   :  { %v450_v37 = vadd.f32 %v449_v35, %v1146_v4 }
 0x13a   :  { %v430_v38 = vadd.f32 %v429_v36, %v1151_v7 }
 0x13b   :  { %v451_v39 = vadd.f32 %v450_v37, %v1156_v10 }
 0x13c   :  { %v431_v40 = vadd.f32 %v430_v38, %v1161_v13 }
 0x13d   :  { %v452_v41 = vadd.f32 %v451_v39, %v1166_v16 }
 0x13e   :  { %v432_v42 = vadd.f32 %v431_v40, %v1171_v19 }
 0x13f   :  { %v453_v43 = vadd.f32 %v452_v41, %v1176_v22 }
 0x140   :  { %v433_v44 = vadd.f32 %v432_v42, %v1181_v25 }
 0x141   :  { %v454_v45 = vadd.f32 %v453_v43, %v1186_v28 }
 0x142   :  { %v434_v46 = vrot.slane %v433_v44, 4 }
 0x143   :  { %v455_v47 = vrot.slane %v454_v45, 4 }
 0x144   :  { %v435_v54 = vadd.f32 %v434_v46, %v433_v44 }
 0x145   :  { %v456_v57 = vadd.f32 %v455_v47, %v454_v45 }
 0x146   :  { %v436_v60 = vrot.slane %v435_v54, 2 }
 0x147   :  { %v457_v63 = vrot.slane %v456_v57, 2 }
 0x148   :  { %v437_v2 = vadd.f32 %v436_v60, %v435_v54 }
 0x149   :  { %v458_v5 = vadd.f32 %v457_v63, %v456_v57 }
 0x14a   :  { %v438_v8 = vrot.slane %v437_v2, 1 }
 0x14b   :  { %v459_v14 = vrot.slane %v458_v5, 1 }
 0x14c   :  { %v439_v11 = vadd.f32 %v438_v8, %v437_v2 }
 0x14d   :  { %v460_v26 = vadd.f32 %v459_v14, %v458_v5 }
 0x14e   :  { %v1205_v17 = vmul.f32 0.0078125, %v439_v11 }
 0x14f   :  { %v1213_v32 = vmul.f32 0.0078125, %v460_v26 }
 0x150   :  { %v464_v20 = vsub.f32 %v1109_v48, %v1205_v17  ;;  %v466_v23 = vsub.f32 %v1117_v52, %v1205_v17  ;;  %v468_v29 = vsub.f32 %v1129_v58, %v1205_v17  ;;  %v470_v33 = vsub.f32 %v1139_v0, %v1205_v17 }
 0x151   :  { %v472_v34 = vsub.f32 %v1149_v6, %v1205_v17  ;;  %v465_v37 = vsub.f32 %v1113_v50, %v1213_v32  ;;  %v467_v38 = vsub.f32 %v1123_v55, %v1213_v32  ;;  %v474_v39 = vsub.f32 %v1159_v12, %v1205_v17 }
 0x152   :  { %v496_v30 = vmul.f32 %v464_v20, %v464_v20  ;;  %v498_v31 = vmul.f32 %v466_v23, %v466_v23  ;;  %v500_v35 = vmul.f32 %v468_v29, %v468_v29  ;;  %v502_v40 = vmul.f32 %v470_v33, %v470_v33 }
 0x153   :  { %v476_v42 = vsub.f32 %v1169_v18, %v1205_v17  ;;  %v504_v43 = vmul.f32 %v472_v34, %v472_v34  ;;  %v469_v45 = vsub.f32 %v1134_v61, %v1213_v32  ;;  %v497_v46 = vmul.f32 %v465_v37, %v465_v37 }
 0x154   :  { %v528_v36 = vadd.f32 %v498_v31, %v496_v30  ;;  %v499_v47 = vmul.f32 %v467_v38, %v467_v38  ;;  %v478_v54 = vsub.f32 %v1179_v24, %v1205_v17  ;;  %v506_v57 = vmul.f32 %v474_v39, %v474_v39 }
 0x155   :  { %v471_v63 = vsub.f32 %v1144_v3, %v1213_v32  ;;  %v480_v2 = vsub.f32 %v1111_v49, %v1205_v17  ;;  %v508_v5 = vmul.f32 %v476_v42, %v476_v42  ;;  %v473_v11 = vsub.f32 %v1154_v9, %v1213_v32 }
 0x156   :  { %v529_v41 = vadd.f32 %v528_v36, %v500_v35  ;;  %v501_v14 = vmul.f32 %v469_v45, %v469_v45  ;;  %v549_v20 = vadd.f32 %v499_v47, %v497_v46  ;;  %v482_v23 = vsub.f32 %v1119_v53, %v1205_v17 }
 0x157   :  { %v510_v26 = vmul.f32 %v478_v54, %v478_v54  ;;  %v475_v30 = vsub.f32 %v1164_v15, %v1213_v32  ;;  %v503_v31 = vmul.f32 %v471_v63, %v471_v63  ;;  %v484_v34 = vsub.f32 %v1131_v59, %v1205_v17 }
 0x158   :  { %v530_v44 = vadd.f32 %v529_v41, %v502_v40  ;;  %v550_v33 = vadd.f32 %v549_v20, %v501_v14  ;;  %v512_v35 = vmul.f32 %v480_v2, %v480_v2  ;;  %v477_v37 = vsub.f32 %v1174_v21, %v1213_v32 }
 0x159   :  { %v505_v38 = vmul.f32 %v473_v11, %v473_v11  ;;  %v486_v40 = vsub.f32 %v1141_v1, %v1205_v17  ;;  %v514_v41 = vmul.f32 %v482_v23, %v482_v23  ;;  %v488_v46 = vsub.f32 %v1151_v7, %v1205_v17 }
 0x15a   :  { %v531_v60 = vadd.f32 %v530_v44, %v504_v43  ;;  %v551_v39 = vadd.f32 %v550_v33, %v503_v31  ;;  %v479_v43 = vsub.f32 %v1184_v27, %v1213_v32  ;;  %v507_v44 = vmul.f32 %v475_v30, %v475_v30 }
 0x15b   :  { %v516_v47 = vmul.f32 %v484_v34, %v484_v34  ;;  %v490_v2 = vsub.f32 %v1161_v13, %v1205_v17  ;;  %v483_v11 = vsub.f32 %v1125_v56, %v1213_v32  ;;  %v492_v23 = vsub.f32 %v1171_v19, %v1205_v17 }
 0x15c   :  { %v532_v8 = vadd.f32 %v531_v60, %v506_v57  ;;  %v552_v45 = vadd.f32 %v551_v39, %v505_v38  ;;  %v481_v57 = vsub.f32 %v1115_v51, %v1213_v32  ;;  %v509_v60 = vmul.f32 %v477_v37, %v477_v37 }
 0x15d   :  { %v511_v14 = vmul.f32 %v479_v43, %v479_v43  ;;  %v485_v30 = vsub.f32 %v1136_v62, %v1213_v32  ;;  %v494_v34 = vsub.f32 %v1181_v25, %v1205_v17  ;;  %v487_v37 = vsub.f32 %v1146_v4, %v1213_v32 }
 0x15e   :  { %v533_v29 = vadd.f32 %v532_v8, %v508_v5  ;;  %v553_v63 = vadd.f32 %v552_v45, %v507_v44  ;;  %v518_v5 = vmul.f32 %v486_v40, %v486_v40  ;;  %v513_v31 = vmul.f32 %v481_v57, %v481_v57 }
 0x15f   :  { %v515_v38 = vmul.f32 %v483_v11, %v483_v11  ;;  %v524_v40 = vmul.f32 %v492_v23, %v492_v23  ;;  %v517_v43 = vmul.f32 %v485_v30, %v485_v30  ;;  %v526_v45 = vmul.f32 %v494_v34, %v494_v34 }
 0x160   :  { %v534_v36 = vadd.f32 %v533_v29, %v510_v26  ;;  %v554_v20 = vadd.f32 %v553_v63, %v509_v60  ;;  %v520_v26 = vmul.f32 %v488_v46, %v488_v46  ;;  %v493_v63 = vsub.f32 %v1176_v22, %v1213_v32 }
 0x161   :  { %v495_v11 = vsub.f32 %v1186_v28, %v1213_v32 }
 0x162   :  { %v535_v42 = vadd.f32 %v534_v36, %v512_v35  ;;  %v555_v33 = vadd.f32 %v554_v20, %v511_v14  ;;  %v522_v35 = vmul.f32 %v490_v2, %v490_v2 }
 0x164   :  { %v536_v54 = vadd.f32 %v535_v42, %v514_v41  ;;  %v556_v39 = vadd.f32 %v555_v33, %v513_v31  ;;  %v489_v42 = vsub.f32 %v1156_v10, %v1213_v32  ;;  %v527_v31 = vmul.f32 %v495_v11, %v495_v11 }
 0x166   :  { %v537_v8 = vadd.f32 %v536_v54, %v516_v47  ;;  %v557_v44 = vadd.f32 %v556_v39, %v515_v38  ;;  %v491_v47 = vsub.f32 %v1166_v16, %v1213_v32  ;;  %v519_v54 = vmul.f32 %v487_v37, %v487_v37 }
 0x167   :  { %v521_v2 = vmul.f32 %v489_v42, %v489_v42 }
 0x168   :  { %v538_v29 = vadd.f32 %v537_v8, %v518_v5  ;;  %v558_v57 = vadd.f32 %v557_v44, %v517_v43  ;;  %v523_v14 = vmul.f32 %v491_v47, %v491_v47 }
 0x16a   :  { %v539_v36 = vadd.f32 %v538_v29, %v520_v26  ;;  %v559_v5 = vadd.f32 %v558_v57, %v519_v54  ;;  %v525_v26 = vmul.f32 %v493_v63, %v493_v63  ;;  %v936_v54 = vmov 1966171168  }
 0x16b   :  { %v581_v57 = vunpack.c.l.s4 %v936_v54 }
 0x16c   :  { %v540_v41 = vadd.f32 %v539_v36, %v522_v35  ;;  %v560_v20 = vadd.f32 %v559_v5, %v521_v2 }
 0x16d   :  { %v582_v63 = vunpack.c.0.s8 %v581_v57 }
 0x16e   :  { %v541_v46 = vadd.f32 %v540_v41, %v524_v40  ;;  %v561_v29 = vadd.f32 %v560_v20, %v523_v14 }
 0x170   :  { %v542_v60 = vadd.f32 %v541_v46, %v526_v45  ;;  %v562_v33 = vadd.f32 %v561_v29, %v525_v26 }
 0x172   :  { %v543_v8 = vrot.slane %v542_v60, 4  ;;  %v563_v35 = vadd.f32 %v562_v33, %v527_v31 }
 0x174   :  { %v544_v23 = vadd.f32 %v543_v8, %v542_v60  ;;  %v564_v37 = vrot.slane %v563_v35, 4  ;;  %v583_v60 = vlaneseq }
 0x176   :  { %v545_v30 = vrot.slane %v544_v23, 2  ;;  %v565_v39 = vadd.f32 %v564_v37, %v563_v35  ;;  %v584_v2 = vshrl.u32 %v583_v60, 7 }
 0x178   :  { %v546_v34 = vadd.f32 %v545_v30, %v544_v23  ;;  %v566_v40 = vrot.slane %v565_v39, 2  ;;  %v585_v8 = vsub.s32 %v582_v63, %v584_v2  ;;  %v572_v23 = vld [vmem:[%s1327_s2] sm:$0x3]  ;;  %v600_v29 = vsub.s32 0, %v584_v2 }
 0x179   :  { %v604_v30 = vsub.s32 1, %v584_v2 }
 0x17a   :  { %v547_v36 = vrot.slane %v546_v34, 1  ;;  %v567_v42 = vadd.f32 %v566_v40, %v565_v39 }
 0x17c   :  { %v548_v38 = vadd.f32 %v547_v36, %v546_v34  ;;  %v568_v43 = vrot.slane %v567_v42, 1 }
 0x17e   :  { %v570_v41 = vmul.f32 0.0078125, %v548_v38  ;;  %v569_v45 = vadd.f32 %v568_v43, %v567_v42 }
 0x180   :  { %v573_v44 = vadd.f32 1e-05, %v570_v41  ;;  %v571_v46 = vmul.f32 0.0078125, %v569_v45 }
 0x182   :  { %908 = vrsqrt.f32 %v573_v44  ;;  %v574_v47 = vadd.f32 1e-05, %v571_v46 }
 0x184   :  { %910 = vrsqrt.f32 %v574_v47 }
 0x18c   :  { %v909_v5 = vpop.eup %908 }
 0x18e   :  { %v911_v11 = vpop.eup %910 }
 0x18f   :  { %v579_v14 = vcombine.low %v909_v5, %v911_v11 }
 0x191   :  { %v586_v20 = vrot.slane %v579_v14, %v585_v8 }
 0x193   :  { %v593_v26 = vrot.slane %v586_v20, %v585_v8 }
 0x195   :  { %v595_v31 = vmul.f32 %v593_v26, %v572_v23 }
 0x197   :  { %v601_v33 = vrot.slane %v595_v31, %v600_v29  ;;  %v605_v34 = vrot.slane %v595_v31, %v604_v30 }
 0x199   :  { %v608_v35 = vmul.f32 %v601_v33, %v1205_v17  ;;  %v609_v36 = vmul.f32 %v605_v34, %v1213_v32  ;;  %v629_v37 = vmul.f32 %v601_v33, %v1109_v48  ;;  %v630_v38 = vmul.f32 %v605_v34, %v1113_v50 }
 0x19a   :  { %v631_v39 = vmul.f32 %v601_v33, %v1117_v52  ;;  %v632_v40 = vmul.f32 %v605_v34, %v1123_v55  ;;  %v633_v41 = vmul.f32 %v601_v33, %v1129_v58  ;;  %v634_v42 = vmul.f32 %v605_v34, %v1134_v61 }
 0x19b   :  { %v612_v43 = vcombine.low %v608_v35, %v609_v36  ;;  %v635_v44 = vmul.f32 %v601_v33, %v1139_v0  ;;  %v636_v45 = vmul.f32 %v605_v34, %v1144_v3  ;;  %v637_v17 = vmul.f32 %v601_v33, %v1149_v6  ;;  %v596_v0 = vld [vmem:[%s1328_s3] sm:$0x3]  ;;  %s937_s3 = smov [#allocation2]  }
 0x19c   :  { %v638_v32 = vmul.f32 %v605_v34, %v1154_v9  ;;  %v639_v48 = vmul.f32 %v601_v33, %v1159_v12  ;;  %v640_v50 = vmul.f32 %v605_v34, %v1164_v15  ;;  %v641_v52 = vmul.f32 %v601_v33, %v1169_v18  ;;  %s741_s8 = sshll.u32 %s937_s3, 4  ;;  %s742_s8 = int_to_ptr.vmem [resolvable:$true] %s741_s8 }
 0x19d   :  { %v619_v55 = vrot.slane %v612_v43, %v585_v8  ;;  %v642_v58 = vmul.f32 %v605_v34, %v1174_v21  ;;  %v643_v61 = vmul.f32 %v601_v33, %v1179_v24  ;;  %v644_v46 = vmul.f32 %v605_v34, %v1184_v27  ;;  %s912_s9 = scalar_lea.vmem %s742_s8, 4096  ;;  %p917_p1 = scmp.lt.s32.totalorder %s742_s8, %s742_s8 }
 0x19e   :  { %v645_v3 = vmul.f32 %v601_v33, %v1111_v49  ;;  %v646_v6 = vmul.f32 %v605_v34, %v1115_v51  ;;  %v647_v9 = vmul.f32 %v601_v33, %v1119_v53  ;;  %v648_v12 = vmul.f32 %v605_v34, %v1125_v56  ;;  %p913_p0 = scmp.ne.s32.totalorder %s742_s8, %s912_s9  ;;  %p918_p2 = scmp.lt.s32.totalorder %s912_s9, %s912_s9 }
 0x19f   :  { %v626_v15 = vrot.slane %v619_v55, %v585_v8  ;;  %v649_v18 = vmul.f32 %v601_v33, %v1131_v59  ;;  %v650_v21 = vmul.f32 %v605_v34, %v1136_v62  ;;  %v651_v24 = vmul.f32 %v601_v33, %v1141_v1 }
 0x1a0   :  { %v652_v27 = vmul.f32 %v605_v34, %v1146_v4  ;;  %v653_v47 = vmul.f32 %v601_v33, %v1151_v7  ;;  %v654_v54 = vmul.f32 %v605_v34, %v1156_v10  ;;  %v655_v49 = vmul.f32 %v601_v33, %v1161_v13  ;;  %p919_p3 = por %p918_p2, %p917_p1 }
 0x1a1   :  { %v628_v51 = vsub.f32 %v596_v0, %v626_v15  ;;  %v656_v53 = vmul.f32 %v605_v34, %v1166_v16  ;;  %v657_v56 = vmul.f32 %v601_v33, %v1171_v19  ;;  %v658_v57 = vmul.f32 %v605_v34, %v1176_v22 }
 0x1a2   :  { %v659_v59 = vmul.f32 %v601_v33, %v1181_v25  ;;  %v660_v62 = vmul.f32 %v605_v34, %v1186_v28  ;;  %p920_p4 = pnand %p919_p3, %p913_p0 }
 0x1a3   :  { %v665_v1 = vrot.slane %v628_v51, %v600_v29  ;;  %v669_v60 = vrot.slane %v628_v51, %v604_v30 }
 0x1a5   :  { %v672_v4 = vadd.f32 %v665_v1, %v629_v37  ;;  %v673_v63 = vadd.f32 %v669_v60, %v630_v38  ;;  %v674_v7 = vadd.f32 %v665_v1, %v631_v39  ;;  %v675_v2 = vadd.f32 %v669_v60, %v632_v40 }
 0x1a6   :  { %v676_v10 = vadd.f32 %v665_v1, %v633_v41  ;;  %v677_v5 = vadd.f32 %v669_v60, %v634_v42  ;;  %v678_v13 = vadd.f32 %v665_v1, %v635_v44  ;;  %v679_v8 = vadd.f32 %v669_v60, %v636_v45 }
 0x1a7   :  { %v680_v11 = vadd.f32 %v665_v1, %v637_v17  ;;  %v681_v16 = vadd.f32 %v669_v60, %v638_v32  ;;  %v682_v14 = vadd.f32 %v665_v1, %v639_v48  ;;  %v683_v19 = vadd.f32 %v669_v60, %v640_v50  ;;  %704 = vst [vmem:[#allocation2] sm:$0xff] %v672_v4 }
 0x1a8   :  { %705 = vst [vmem:[#allocation2 + $0x8] sm:$0xff] %v673_v63  ;;  %706 = vst [vmem:[#allocation2 + $0x10] sm:$0xff] %v674_v7  ;;  %v684_v22 = vadd.f32 %v665_v1, %v641_v52  ;;  %v685_v25 = vadd.f32 %v669_v60, %v642_v58  ;;  %v686_v28 = vadd.f32 %v665_v1, %v643_v61 }
 0x1a9   :  { %707 = vst [vmem:[#allocation2 + $0x18] sm:$0xff] %v675_v2  ;;  %v687_v20 = vadd.f32 %v669_v60, %v644_v46  ;;  %708 = vst [vmem:[#allocation2 + $0x20] sm:$0xff] %v676_v10  ;;  %v688_v23 = vadd.f32 %v665_v1, %v645_v3  ;;  %v689_v26 = vadd.f32 %v669_v60, %v646_v6 }
 0x1aa   :  { %709 = vst [vmem:[#allocation2 + $0x28] sm:$0xff] %v677_v5  ;;  %710 = vst [vmem:[#allocation2 + $0x30] sm:$0xff] %v678_v13  ;;  %v690_v29 = vadd.f32 %v665_v1, %v647_v9  ;;  %v691_v30 = vadd.f32 %v669_v60, %v648_v12  ;;  %v692_v31 = vadd.f32 %v665_v1, %v649_v18 }
 0x1ab   :  { %711 = vst [vmem:[#allocation2 + $0x38] sm:$0xff] %v679_v8  ;;  %712 = vst [vmem:[#allocation2 + $0x40] sm:$0xff] %v680_v11  ;;  %v693_v33 = vadd.f32 %v669_v60, %v650_v21  ;;  %v694_v34 = vadd.f32 %v665_v1, %v651_v24  ;;  %v695_v35 = vadd.f32 %v669_v60, %v652_v27 }
 0x1ac   :  { %713 = vst [vmem:[#allocation2 + $0x48] sm:$0xff] %v681_v16  ;;  %714 = vst [vmem:[#allocation2 + $0x50] sm:$0xff] %v682_v14  ;;  %v696_v36 = vadd.f32 %v665_v1, %v653_v47  ;;  %v697_v37 = vadd.f32 %v669_v60, %v654_v54  ;;  %v698_v38 = vadd.f32 %v665_v1, %v655_v49 }
 0x1ad   :  { %715 = vst [vmem:[#allocation2 + $0x58] sm:$0xff] %v683_v19  ;;  %716 = vst [vmem:[#allocation2 + $0x60] sm:$0xff] %v684_v22  ;;  %v699_v39 = vadd.f32 %v669_v60, %v656_v53  ;;  %v700_v40 = vadd.f32 %v665_v1, %v657_v56  ;;  %v701_v41 = vadd.f32 %v669_v60, %v658_v57 }
 0x1ae   :  { %717 = vst [vmem:[#allocation2 + $0x68] sm:$0xff] %v685_v25  ;;  %718 = vst [vmem:[#allocation2 + $0x70] sm:$0xff] %v686_v28  ;;  %v702_v42 = vadd.f32 %v665_v1, %v659_v59  ;;  %v703_v43 = vadd.f32 %v669_v60, %v660_v62 }
 0x1af   :  { %719 = vst [vmem:[#allocation2 + $0x78] sm:$0xff] %v687_v20  ;;  %720 = vst [vmem:[#allocation2 + $0x80] sm:$0xff] %v688_v23 }
 0x1b0   :  { %721 = vst [vmem:[#allocation2 + $0x88] sm:$0xff] %v689_v26  ;;  %722 = vst [vmem:[#allocation2 + $0x90] sm:$0xff] %v690_v29 }
 0x1b1   :  { %723 = vst [vmem:[#allocation2 + $0x98] sm:$0xff] %v691_v30  ;;  %724 = vst [vmem:[#allocation2 + $0xa0] sm:$0xff] %v692_v31 }
 0x1b2   :  { %725 = vst [vmem:[#allocation2 + $0xa8] sm:$0xff] %v693_v33  ;;  %726 = vst [vmem:[#allocation2 + $0xb0] sm:$0xff] %v694_v34 }
 0x1b3   :  { %727 = vst [vmem:[#allocation2 + $0xb8] sm:$0xff] %v695_v35  ;;  %728 = vst [vmem:[#allocation2 + $0xc0] sm:$0xff] %v696_v36 }
 0x1b4   :  { %729 = vst [vmem:[#allocation2 + $0xc8] sm:$0xff] %v697_v37  ;;  %730 = vst [vmem:[#allocation2 + $0xd0] sm:$0xff] %v698_v38 }
 0x1b5   :  { %731 = vst [vmem:[#allocation2 + $0xd8] sm:$0xff] %v699_v39  ;;  %732 = vst [vmem:[#allocation2 + $0xe0] sm:$0xff] %v700_v40 }
 0x1b6   :  { %733 = vst [vmem:[#allocation2 + $0xe8] sm:$0xff] %v701_v41  ;;  %734 = vst [vmem:[#allocation2 + $0xf0] sm:$0xff] %v702_v42 }
 0x1b7   :  { %735 = vst [vmem:[#allocation2 + $0xf8] sm:$0xff] %v703_v43 }
 0x1b8   :  { %923 = shalt.err (!%p920_p4)
}
 0x1b9   :  { %s924_s12 = scalar_lea.hbm %s1329_s4, 4096 }
 0x1ba   :  { %p925_p5 = scmp.ne.s32.totalorder %s1329_s4, %s924_s12  ;;  %p928_p6 = scmp.lt.u32.totalorder %s924_s12, %s1329_s4 }
 0x1bc   :  { %p930_p7 = pnand %p928_p6, %p925_p5 }
 0x1be   :  { %933 = shalt.err (!%p930_p7)
}
 0x1bf   :  { %s938_s16 = smov 256   ;;  %s939_s17 = smov 16  }
 0x1c0   :  { %747 = dma.vmem_to_hbm [thread:$0]  %s742_s8, 4096, %s1329_s4, [#allocation3], %s938_s16, %s938_s16, %s939_s17  }
 0x1c1   :  { %934 = dma.done.wait [#allocation3], 4096  }
 0x1c2   :  { %935 = vsyncadd [#allocation3], 4294963200 }
 0x1c3   :  { %751 = vsyncpa [#allocation3], 1 }

</bundles_post_ra>
